<compile_context>
chip_gen: v7x
topology: tpu7x:2x2x1
jax: 0.10.0
libtpu: 0.0.40
codegen_flags: <defaults>
</compile_context>

<pallas_src>
import functools

import jax
import jax.numpy as jnp
from jax.experimental import pallas as pl
from jax.experimental.pallas import tpu as pltpu


# ---------------------------------------------------------------------------
# Fused Pallas kernel: (per block of G groups)  feat -> MLP layers -> max over k
# ---------------------------------------------------------------------------

def _fused_mlp_maxpool_kernel(*refs, n_layers, k):
    """refs = (feat_ref, [w_t, shift] * n_layers, o_ref).

    feat_ref : (G*k, Cin_pad)  bf16   grouped/centered features
    w_t      : (Cin_i, Cout_i) bf16   pre-transposed conv weight with BN scale folded in
    shift    : (1, Cout_i)     f32    folded conv-bias + BN shift
    o_ref    : (G, Cout_pad)   bf16   max over the k samples of each group (128-lane dense)
    """
    feat_ref = refs[0]
    layer_refs = refs[1:1 + 2 * n_layers]
    o_ref = refs[1 + 2 * n_layers]

    y = feat_ref[...]                                            # bf16 (G*k, Cin_pad)
    for i in range(n_layers):
        w = layer_refs[2 * i][...]                               # bf16 (Cin_i, Cout_i)
        sh = layer_refs[2 * i + 1][...]                          # f32  (1, Cout_i)
        y = jnp.dot(y, w, preferred_element_type=jnp.float32)    # MXU, f32 accumulate
        y = jnp.maximum(y + sh, 0.0)                             # add+ReLU epilogue (VPU)
        if i + 1 < n_layers:
            y = y.astype(jnp.bfloat16)                           # bf16 for next MXU pass

    rows, c_last = y.shape
    # c_last is a multiple of 128 -> this reshape is a free (8,128)-tile view.
    pooled = jnp.max(y.reshape(rows // k, k, c_last), axis=1)    # sublane max over k
    o_ref[...] = pooled.astype(o_ref.dtype)


def _round_up(x, m):
    return (x + m - 1) // m * m


def _pick_groups_per_block(n_groups, k, target_rows=4096, min_grid_steps=4):
    """Groups per grid step.

    Aims for ~target_rows feature rows per block (amortizes the ~0.35us/step overhead and
    gives the MXU >=256 result rows per pass), with G*k a multiple of 256, while keeping
    the grid long enough (>= min_grid_steps) for v7x 2-TensorCore sharding when possible.
    """
    g_align = max(32, 256 // max(k, 1))                  # G multiple -> G*k % 256 == 0
    g = max(g_align, (target_rows // max(k, 1)) // g_align * g_align)
    g = min(g, _round_up(n_groups, g_align))
    while g > g_align and -(-n_groups // g) < min_grid_steps:
        g -= g_align
    return g


def fused_mlp_maxpool(feat, params, *, k, groups_per_block):
    """feat: (n_groups*k, Cin_pad) bf16 -> (n_groups, Cout_pad) bf16 (max over k)."""
    rows, cin = feat.shape
    n_groups = rows // k
    G = groups_per_block
    assert rows == n_groups * k
    assert n_groups % G == 0, (G, n_groups)

    n_layers = len(params)
    c_last = params[-1][0].shape[1]                      # lane-padded (multiple of 128)

    flat_params = []
    in_specs = [pl.BlockSpec((G * k, cin), lambda g: (g, 0))]
    for (w_t, shift) in params:
        cout = w_t.shape[1]
        flat_params += [w_t, shift]
        in_specs += [
            pl.BlockSpec(w_t.shape, lambda g: (0, 0)),   # constant blocks: DMA'd once
            pl.BlockSpec((1, cout), lambda g: (0, 0)),
        ]

    kernel = functools.partial(_fused_mlp_maxpool_kernel, n_layers=n_layers, k=k)
    return pl.pallas_call(
        kernel,
        out_shape=jax.ShapeDtypeStruct((n_groups, c_last), jnp.bfloat16),
        grid=(n_groups // G,),
        in_specs=in_specs,
        out_specs=pl.BlockSpec((G, c_last), lambda g: (g, 0)),
        compiler_params=pltpu.CompilerParams(
            dimension_semantics=("parallel",),           # group tiles shard across TCs
            vmem_limit_bytes=32 * 1024 * 1024),          # ~3 MiB/block; safe on v7x 64 MiB
    )(feat, *flat_params)


# ---------------------------------------------------------------------------
# Plain-JAX glue: FPS, ball query, grouping (data-dependent / sequential)
# ---------------------------------------------------------------------------

def farthest_point_sampling(pos, n_sample, key):
    """pos: (B, N, 3) -> centroids (B, n_sample, 3) (random start point per batch)."""
    B, N, _ = pos.shape
    starts = jax.random.randint(key, (B,), 0, N).astype(jnp.int32)

    def single(p, start):
        dists0 = jnp.full((N,), jnp.inf, jnp.float32)
        idxs0 = jnp.zeros((n_sample,), jnp.int32).at[0].set(start)

        def body(i, carry):
            idxs, dists = carry
            last = p[idxs[i - 1]]
            d = jnp.sum((p - last[None, :]) ** 2, axis=-1)
            dists = jnp.minimum(dists, d)
            nxt = jnp.argmax(dists).astype(jnp.int32)
            return idxs.at[i].set(nxt), dists

        idxs, _ = jax.lax.fori_loop(1, n_sample, body, (idxs0, dists0))
        return idxs

    idx = jax.vmap(single)(pos, starts)                               # (B, n_sample)
    centroid = jnp.take_along_axis(pos, idx[:, :, None], axis=1)      # (B, n_sample, 3)
    return centroid, idx


def ball_query(centroid, pos, k, radius):
    """First k point indices (into pos) with dist^2 < radius^2 per centroid; -1 pad."""
    N = pos.shape[1]
    diff = centroid[:, :, None, :] - pos[:, None, :, :]               # (B, M, N, 3)
    dist2 = jnp.sum(diff * diff, axis=-1)                             # (B, M, N)
    mask = dist2 < radius ** 2
    # Vectorized "first K valid indices in order" via top_k of the smallest keys.
    keys = jnp.where(mask, jnp.arange(N, dtype=jnp.int32), N)         # invalid -> N
    neg_top, _ = jax.lax.top_k(-keys, k)                              # k smallest keys
    first_k = -neg_top                                                # ascending order
    return jnp.where(first_k >= N, -1, first_k)                       # (B, M, k)


def sample_and_group(x, n_out_point, n_sample, radius, start_key):
    pos = x[:, :, :3]
    centroid, _ = farthest_point_sampling(pos, n_out_point, start_key)
    group_idx = ball_query(centroid, pos, n_sample, radius)           # (B, M, k)
    padding = group_idx == -1
    safe_idx = jnp.where(padding, 0, group_idx)
    grouped = jax.vmap(lambda xb, ib: xb[ib])(x, safe_idx)            # (B, M, k, C)
    grouped = grouped.at[:, :, :, :3].add(-centroid[:, :, None, :])
    # Reference module zeroes padded neighbors BEFORE the MLP; keep that semantics.
    grouped = jnp.where(padding[..., None], jnp.float32(0.0), grouped)
    return centroid, grouped


# ---------------------------------------------------------------------------
# Parameter init (deterministic, synthetic) and forward pass
# ---------------------------------------------------------------------------

def init_mlp_params(key, dims, cin_pad_to=8, cout_last_pad_to=128, eps=1e-5):
    """Per layer: Conv1d(k=1) weight/bias + BatchNorm1d(eval) folded to (weight, shift).

    The BN scale is folded into the pre-transposed (Cin, Cout) bf16 weight; the first
    layer's Cin is zero-padded to `cin_pad_to`, the last layer's Cout (and its shift) are
    zero-padded to `cout_last_pad_to` so the kernel's output block is 128-lane dense.
    """
    params = []
    n = len(dims) - 1
    for i in range(n):
        key, kw, kb, kg, kbe = jax.random.split(key, 5)
        cin, cout = dims[i], dims[i + 1]
        w = jax.random.normal(kw, (cout, cin), jnp.float32) / jnp.sqrt(float(cin))
        b = 0.01 * jax.random.normal(kb, (cout,), jnp.float32)
        gamma = 1.0 + 0.1 * jax.random.normal(kg, (cout,), jnp.float32)
        beta = 0.1 * jax.random.normal(kbe, (cout,), jnp.float32)
        run_mean = jnp.zeros((cout,), jnp.float32)
        run_var = jnp.ones((cout,), jnp.float32)
        scale = gamma / jnp.sqrt(run_var + eps)
        shift = beta + (b - run_mean) * scale
        w_t = w.T * scale[None, :]                                      # BN scale folded
        if i == 0 and cin_pad_to is not None and cin_pad_to > cin:
            w_t = jnp.pad(w_t, ((0, cin_pad_to - cin), (0, 0)))
        if i == n - 1 and cout_last_pad_to is not None and cout_last_pad_to > cout:
            pad = cout_last_pad_to - cout
            w_t = jnp.pad(w_t, ((0, 0), (0, pad)))
            shift = jnp.pad(shift, (0, pad))
        params.append((w_t.astype(jnp.bfloat16),
                       shift.reshape(1, -1).astype(jnp.float32)))
    return params


def set_abstraction_ssg(x, params, start_key, *, n_out_point, n_sample, radius,
                        n_feat_out, groups_per_block=None):
    B, N, C = x.shape
    centroid, grouped = sample_and_group(x, n_out_point, n_sample, radius, start_key)

    # Pad input channels to the first layer's (sublane-aligned) Cin and cast to bf16.
    cin_pad = params[0][0].shape[0]
    if cin_pad > C:
        grouped = jnp.pad(grouped, ((0, 0), (0, 0), (0, 0), (0, cin_pad - C)))
    feat = grouped.reshape(B * n_out_point * n_sample, cin_pad).astype(jnp.bfloat16)

    # Collapse batch into the group/row axis and pad group count to a block multiple.
    n_groups = B * n_out_point
    G = (groups_per_block if groups_per_block is not None
         else _pick_groups_per_block(n_groups, n_sample))
    ng_pad = _round_up(n_groups, G)
    if ng_pad > n_groups:
        feat = jnp.pad(feat, ((0, (ng_pad - n_groups) * n_sample), (0, 0)))

    pooled = fused_mlp_maxpool(feat, params, k=n_sample, groups_per_block=G)
    pooled = pooled[:n_groups, :n_feat_out].astype(jnp.float32)
    pooled = pooled.reshape(B, n_out_point, n_feat_out)                 # (B, M, mlp[-1]-3)
    return jnp.concatenate([centroid, pooled], axis=2)                  # (B, M, mlp[-1])


# ---------------------------------------------------------------------------

if __name__ == "__main__":
    B, N, C = 2, 128, 6             # batch, points, channels (xyz + 3 features)
    n_out_point = 32                # FPS output points
    ball_query_n_sample = 8         # K neighbors per centroid (multiple of 8)
    ball_query_radius = 0.5
    mlp_layers = [C, 32, 64]        # MLPConv1D gets [6, 32, 61]; +3 centroid xyz on output

    key = jax.random.PRNGKey(0)
    k_x, k_start, k_params = jax.random.split(key, 3)
    x = jax.random.normal(k_x, (B, N, C), jnp.float32)

    params = init_mlp_params(k_params, mlp_layers[:-1] + [mlp_layers[-1] - 3],
                             cin_pad_to=8, cout_last_pad_to=128)

    fwd = jax.jit(functools.partial(
        set_abstraction_ssg,
        n_out_point=n_out_point,
        n_sample=ball_query_n_sample,
        radius=ball_query_radius,
        n_feat_out=mlp_layers[-1] - 3))   # groups_per_block auto-picked (~4096 rows/step)
    out = jax.block_until_ready(fwd(x, params, k_start))
    assert out.shape == (B, n_out_point, mlp_layers[-1]), out.shape
    assert out.dtype == jnp.float32
    print("KERNEL_OK")
</pallas_src>

<mosaic_0001>
module attributes {stable_mosaic.version = 11 : i64} {
  func.func @_fused_mlp_maxpool_kernel(%arg0: i32, %arg1: memref<256x8xbf16, #tpu.memory_space<vmem>>, %arg2: memref<8x32xbf16, #tpu.memory_space<vmem>>, %arg3: memref<1x32xf32, #tpu.memory_space<vmem>>, %arg4: memref<32x128xbf16, #tpu.memory_space<vmem>>, %arg5: memref<1x128xf32, #tpu.memory_space<vmem>>, %arg6: memref<32x128xbf16, #tpu.memory_space<vmem>>) attributes {dimension_semantics = [#tpu.dimension_semantics<parallel>], iteration_bounds = array<i64: 2>, scalar_prefetch = 0 : i64, scratch_operands = 0 : i64, tpu.core_type = #tpu.core_type<tc>, window_params = [{transform_indices = @transform_0, window_bounds = array<i64: 256, 8>}, {pipeline_mode = #tpu.pipeline_mode<synchronous>, transform_indices = @transform_1, window_bounds = array<i64: 8, 32>}, {pipeline_mode = #tpu.pipeline_mode<synchronous>, transform_indices = @transform_2, window_bounds = array<i64: 1, 32>}, {pipeline_mode = #tpu.pipeline_mode<synchronous>, transform_indices = @transform_3, window_bounds = array<i64: 32, 128>}, {pipeline_mode = #tpu.pipeline_mode<synchronous>, transform_indices = @transform_4, window_bounds = array<i64: 1, 128>}, {transform_indices = @transform_5, window_bounds = array<i64: 32, 128>}]} {
    %c0 = arith.constant 0 : index
    %c0_0 = arith.constant 0 : index
    %0 = vector.load %arg1[%c0, %c0_0] : memref<256x8xbf16, #tpu.memory_space<vmem>>, vector<256x8xbf16>
    %c0_1 = arith.constant 0 : index
    %c0_2 = arith.constant 0 : index
    %1 = vector.load %arg2[%c0_1, %c0_2] : memref<8x32xbf16, #tpu.memory_space<vmem>>, vector<8x32xbf16>
    %c0_3 = arith.constant 0 : index
    %c0_4 = arith.constant 0 : index
    %2 = vector.load %arg3[%c0_3, %c0_4] : memref<1x32xf32, #tpu.memory_space<vmem>>, vector<1x32xf32>
    %cst = arith.constant dense<0.000000e+00> : vector<256x32xf32>
    %3 = tpu.matmul %0, %1, %cst {dimension_numbers = #tpu.dot_dimension_numbers<[1], [0], [0], [1], [0, 0, 1, 1], [], []>} : vector<256x8xbf16>, vector<8x32xbf16>, vector<256x32xf32> -> vector<256x32xf32>
    %4 = vector.broadcast %2 : vector<1x32xf32> to vector<256x32xf32>
    %5 = arith.addf %3, %4 : vector<256x32xf32>
    %cst_5 = arith.constant 0.000000e+00 : f32
    %6 = vector.broadcast %cst_5 : f32 to vector<256x32xf32>
    %7 = arith.maximumf %5, %6 : vector<256x32xf32>
    %8 = arith.truncf %7 : vector<256x32xf32> to vector<256x32xbf16>
    %c0_6 = arith.constant 0 : index
    %c0_7 = arith.constant 0 : index
    %9 = vector.load %arg4[%c0_6, %c0_7] : memref<32x128xbf16, #tpu.memory_space<vmem>>, vector<32x128xbf16>
    %c0_8 = arith.constant 0 : index
    %c0_9 = arith.constant 0 : index
    %10 = vector.load %arg5[%c0_8, %c0_9] : memref<1x128xf32, #tpu.memory_space<vmem>>, vector<1x128xf32>
    %cst_10 = arith.constant dense<0.000000e+00> : vector<256x128xf32>
    %11 = tpu.matmul %8, %9, %cst_10 {dimension_numbers = #tpu.dot_dimension_numbers<[1], [0], [0], [1], [0, 0, 1, 1], [], []>} : vector<256x32xbf16>, vector<32x128xbf16>, vector<256x128xf32> -> vector<256x128xf32>
    %12 = vector.broadcast %10 : vector<1x128xf32> to vector<256x128xf32>
    %13 = arith.addf %11, %12 : vector<256x128xf32>
    %cst_11 = arith.constant 0.000000e+00 : f32
    %14 = vector.broadcast %cst_11 : f32 to vector<256x128xf32>
    %15 = arith.maximumf %13, %14 : vector<256x128xf32>
    %16 = vector.shape_cast %15 : vector<256x128xf32> to vector<32x8x128xf32>
    %cst_12 = arith.constant dense<0xFF800000> : vector<32x128xf32>
    %17 = vector.multi_reduction <maximumf>, %16, %cst_12 [1] : vector<32x8x128xf32> to vector<32x128xf32>
    %18 = arith.truncf %17 : vector<32x128xf32> to vector<32x128xbf16>
    %c0_13 = arith.constant 0 : index
    %c0_14 = arith.constant 0 : index
    %19 = vector.load %arg6[%c0_13, %c0_14] : memref<32x128xbf16, #tpu.memory_space<vmem>>, vector<32x128xbf16>
    tpu.vector_store %arg6[%c0_13, %c0_14], %18 {strides = array<i32>} : memref<32x128xbf16, #tpu.memory_space<vmem>>, vector<32x128xbf16>,
    return
  }
  func.func @transform_0(%arg0: i32) -> (i32, i32) {
    %c0_i32 = arith.constant 0 : i32
    %c0_i32_0 = arith.constant 0 : i32
    return %arg0, %c0_i32 : i32, i32
  }
  func.func @transform_1(%arg0: i32) -> (i32, i32) {
    %c0_i32 = arith.constant 0 : i32
    %c0_i32_0 = arith.constant 0 : i32
    %c0_i32_1 = arith.constant 0 : i32
    return %c0_i32, %c0_i32_0 : i32, i32
  }
  func.func @transform_2(%arg0: i32) -> (i32, i32) {
    %c0_i32 = arith.constant 0 : i32
    %c0_i32_0 = arith.constant 0 : i32
    %c0_i32_1 = arith.constant 0 : i32
    return %c0_i32, %c0_i32_0 : i32, i32
  }
  func.func @transform_3(%arg0: i32) -> (i32, i32) {
    %c0_i32 = arith.constant 0 : i32
    %c0_i32_0 = arith.constant 0 : i32
    %c0_i32_1 = arith.constant 0 : i32
    return %c0_i32, %c0_i32_0 : i32, i32
  }
  func.func @transform_4(%arg0: i32) -> (i32, i32) {
    %c0_i32 = arith.constant 0 : i32
    %c0_i32_0 = arith.constant 0 : i32
    %c0_i32_1 = arith.constant 0 : i32
    return %c0_i32, %c0_i32_0 : i32, i32
  }
  func.func @transform_5(%arg0: i32) -> (i32, i32) {
    %c0_i32 = arith.constant 0 : i32
    %c0_i32_0 = arith.constant 0 : i32
    return %arg0, %c0_i32 : i32, i32
  }
}

</mosaic_0001>

<bundles_post_ra>
// kernel: custom-call.6
= control target key start
LH: loop header
LB: loop body
LE: loop exit
PB: predicated region body
PF: predicated region fallthrough
CT: control target
= control target key end

     0   :  { %s6_s0 = inlined_call_operand.vmem [shape: f32[2,128], index: 0, kind: output, shape index: {}]  }

// kernel: set_abstraction_ssg.1
= control target key start
LH: loop header
LB: loop body
LE: loop exit
PB: predicated region body
PF: predicated region fallthrough
CT: control target
= control target key end

     0   :  { %s1628_s18 = smov 0   ;;  %s1849_s0 = inlined_call_operand.vmem [shape: bf16[512,8], index: 0, kind: input, shape index: {}]   ;;  %s1850_s1 = inlined_call_operand.vmem [shape: bf16[8,32], index: 1, kind: input, shape index: {}]   ;;  %s1851_s2 = inlined_call_operand.vmem [shape: f32[1,32], index: 2, kind: input, shape index: {}]   ;;  %s1852_s3 = inlined_call_operand.vmem [shape: bf16[32,128], index: 3, kind: input, shape index: {}]   ;;  %s1853_s4 = inlined_call_operand.vmem [shape: f32[1,128], index: 4, kind: input, shape index: {}]   ;;  %s1854_s5 = inlined_call_operand.vmem [shape: bf16[64,128], index: 5, kind: output, shape index: {}]  }
   0x1 LB: > { %s1331_s19 = sadd.s32 4294967295, %s1596_s18   ;;  %p1335_p0 = scmp.ge.s32.totalorder %s1596_s18, 1  ;;  %s1596_s18 = sphi %s1628_s18, %s15_s18  }
   0x2   : > { %p188_p1 = scmp.lt.s32.totalorder %s1596_s18, 3 }
   0x4   : > { %p189_p2 = pnand %p1335_p0, %p188_p1 }
   0x5   : > { %v261_v0 = vld [vmem:[%s1850_s1] sm:$0xf] (!%p189_p2)  ;;  %vm398_vm0 = vcmask (!%p189_p2), 1043456   ;;  %s1336_s22 = sshll.u32 (!%p189_p2), %s1331_s19, 5  ;;  %vm349_vm1 = vcmask (!%p189_p2), 64512   ;;  %v1589_v19 = vld [vmem:[%s1852_s3 + $0x8] sm:$0xff] (!%p189_p2)  }
   0x6   : > { %192 = sbr.rel (%p189_p2) target bundleno = 557 (0x22d), region = 40  ;;  %1563 = vmatprep.subr.msk.bf16.mxu0 (!%p189_p2), %vm398_vm0, %v261_v0  ;;  %v400_v1 = vsel (!%p189_p2), %vm398_vm0, %v261_v0, 0  ;;  %p217_p3 = scmp.lt.s32.totalorder (!%p189_p2), %s1336_s22, 63  ;;  %v1588_v18 = vld [vmem:[%s1852_s3] sm:$0xff] (!%p189_p2)   ;;  %vm634_vm2 = vcmask (!%p189_p2), 261120   ;;  %vm1228_vm3 = vcmask (!%p189_p2), 1041409  }
   0x7   : > { %1494 = vmatpush3.bf16.msra.mxu0 (!%p189_p2), %v400_v1  ;;  %1527 = vmatprep.subr.bf16.mxu1 (!%p189_p2), %v1588_v18  ;;  %v1687_v20 = vld [vmem:[%s1851_s2] ss:$0 sm:$0xff] (!%p189_p2)  ;;  %vm1230_vm4 = vcmask (!%p189_p2), 1042434   ;;  %vm1232_vm5 = vcmask (!%p189_p2), 1043459   ;;  %vm1234_vm6 = vcmask (!%p189_p2), 1044484   ;;  %s1752_s10 = sshll.u32 (!%p189_p2), %s1331_s19, 2 }
   0x8   : > { %1528 = vmatpush3.bf16.msra.mxu1 (!%p189_p2), %v1588_v18  ;;  %vm1236_vm7 = vcmask (!%p189_p2), 1045509   ;;  %vm1238_vm8 = vcmask (!%p189_p2), 1046534   ;;  %p223_p4 = scmp.lt.s32.totalorder (!%p189_p2), %s1752_s10, 7  ;;  %vm1240_vm9 = vcmask (!%p189_p2), 1047559  }
   0x9   : > { %1529 = vmatprep.subr.bf16.mxu1 (!%p189_p2), %v1589_v19 }
   0xc   : > { %1530 = vmatpush3.bf16.msra.mxu1 (!%p189_p2), %v1589_v19 }
   0xd   : > { %s1856_s22 = smov (!%p217_p3, %s1336_s22), 63  ;;  %s1858_s10 = smov (!%p223_p4, %s1752_s10), 7 }
   0xe   : > { %s1337_s23 = sshll.u32 %s1856_s22, 2  ;;  %s1339_s11 = sshll.u32 %s1858_s10, 2 }
   0xf   : > { %s1644_s26 = scalar_lea.vmem %s1849_s0, %s1337_s23  ;;  %s1777_s14 = scalar_lea.vmem %s1854_s5, %s1339_s11 }
  0x10   : > { %v1572_v2 = vld [vmem:[%s1644_s26] sm:$0xff]   ;;  %v1573_v3 = vld [vmem:[%s1644_s26 + $0x8] sm:$0xff]   ;;  %v1574_v4 = vld [vmem:[%s1644_s26 + $0x10] sm:$0xff]  }
  0x11   : > { %1495 = vmatprep.mubr.msk.bf16.mxu0 %vm349_vm1, %v1572_v2  ;;  %v1575_v5 = vld [vmem:[%s1644_s26 + $0x18] sm:$0xff]   ;;  %v1576_v6 = vld [vmem:[%s1644_s26 + $0x20] sm:$0xff]   ;;  %v1577_v7 = vld [vmem:[%s1644_s26 + $0x28] sm:$0xff]  }
  0x12   : > { %1496 = vmatmul.mubr.msk.bf16.vlgmr.msra.gmra.mrb[0].mxu0 %vm349_vm1, %v1573_v3  ;;  %v1578_v8 = vld [vmem:[%s1644_s26 + $0x30] sm:$0xff]   ;;  %v1579_v9 = vld [vmem:[%s1644_s26 + $0x38] sm:$0xff]   ;;  %v1580_v10 = vld [vmem:[%s1644_s26 + $0x40] sm:$0xff]  }
  0x13   : > { %1499 = vmatprep.mubr.msk.bf16.mxu0 %vm349_vm1, %v1574_v4  ;;  %v1581_v11 = vld [vmem:[%s1644_s26 + $0x48] sm:$0xff]   ;;  %v1582_v12 = vld [vmem:[%s1644_s26 + $0x50] sm:$0xff]   ;;  %v1583_v13 = vld [vmem:[%s1644_s26 + $0x58] sm:$0xff]  }
  0x14   : > { %v1584_v14 = vld [vmem:[%s1644_s26 + $0x60] sm:$0xff]   ;;  %v1585_v15 = vld [vmem:[%s1644_s26 + $0x68] sm:$0xff]   ;;  %v1586_v16 = vld [vmem:[%s1644_s26 + $0x70] sm:$0xff]  }
  0x15   : > { %v1587_v17 = vld [vmem:[%s1644_s26 + $0x78] sm:$0xff]  }
  0x1a   : > { %1500 = vmatmul.mubr.msk.bf16.gmra.mrb[4].mxu0 %vm349_vm1, %v1575_v5 }
  0x1b   : > { %1503 = vmatprep.mubr.msk.bf16.mxu0 %vm349_vm1, %v1576_v6 }
  0x22   : > { %1504 = vmatmul.mubr.msk.bf16.gmra.mrb[8].mxu0 %vm349_vm1, %v1577_v7 }
  0x23   : > { %1507 = vmatprep.mubr.msk.bf16.mxu0 %vm349_vm1, %v1578_v8 }
  0x2a   : > { %1508 = vmatmul.mubr.msk.bf16.gmra.mrb[12].mxu0 %vm349_vm1, %v1579_v9 }
  0x2b   : > { %1511 = vmatprep.mubr.msk.bf16.mxu0 %vm349_vm1, %v1580_v10 }
  0x32   : > { %1512 = vmatmul.mubr.msk.bf16.gmra.mrb[16].mxu0 %vm349_vm1, %v1581_v11 }
  0x33   : > { %1515 = vmatprep.mubr.msk.bf16.mxu0 %vm349_vm1, %v1582_v12 }
  0x3a   : > { %1516 = vmatmul.mubr.msk.bf16.gmra.mrb[20].mxu0 %vm349_vm1, %v1583_v13 }
  0x3b   : > { %1519 = vmatprep.mubr.msk.bf16.mxu0 %vm349_vm1, %v1584_v14 }
  0x42   : > { %1520 = vmatmul.mubr.msk.bf16.gmra.mrb[24].mxu0 %vm349_vm1, %v1585_v15 }
  0x43   : > { %1523 = vmatprep.mubr.msk.bf16.mxu0 %vm349_vm1, %v1586_v16 }
  0x4a   : > { %1524 = vmatmul.mubr.msk.bf16.gmra.mrb[28].mxu0 %vm349_vm1, %v1587_v17 }
  0xe5   : > { %v1497_v21 = vpop.f32.mrb[0].mxu0 }
  0xe6   : > { %v445_v22 = vadd.f32 %v1497_v21, %v1687_v20  ;;  %v436_v23 = vpop.f32.mrb[1].mxu0 }
  0xe7   : > { %v437_v24 = vadd.f32 %v1687_v20, %v436_v23  ;;  %v1498_v25 = vpop.f32.mrb[2].mxu0 }
  0xe8   : > { %v448_v26 = vadd.f32 %v1498_v25, %v1687_v20  ;;  %v439_v27 = vpop.f32.mrb[3].mxu0  ;;  %v565_v29 = vmax.f32 %v445_v22, 0.0 }
  0xe9   : > { %v440_v28 = vadd.f32 %v1687_v20, %v439_v27  ;;  %v563_v31 = vmax.f32 %v437_v24, 0.0 }
  0xea   : > { %v566_v30 = vmax.f32 %v448_v26, 0.0 }
  0xeb   : > { %v564_v32 = vmax.f32 %v440_v28, 0.0 }
  0xec   : > { %v596_v33 = vpack.c.bf16 %v566_v30, %v565_v29 }
  0xed   : > { %v1501_v34 = vpop.f32.mrb[4].mxu0  ;;  %v595_v35 = vpack.c.bf16 %v564_v32, %v563_v31 }
  0xee   : > { %v461_v36 = vadd.f32 %v1501_v34, %v1687_v20  ;;  %v452_v37 = vpop.f32.mrb[5].mxu0 }
  0xef   : > { %v453_v38 = vadd.f32 %v1687_v20, %v452_v37  ;;  %v1502_v39 = vpop.f32.mrb[6].mxu0  ;;  %1531 = vmatprep.mubr.msk.bf16.mxu1 %vm634_vm2, %v595_v35 }
  0xf0   : > { %v464_v40 = vadd.f32 %v1502_v39, %v1687_v20  ;;  %v455_v41 = vpop.f32.mrb[7].mxu0  ;;  %1532 = vmatmul.mubr.msk.bf16.vlgmr.msra.gmra.mrb[0].mxu1 %vm634_vm2, %v596_v33  ;;  %v569_v43 = vmax.f32 %v461_v36, 0.0 }
  0xf1   : > { %v456_v42 = vadd.f32 %v1687_v20, %v455_v41  ;;  %v567_v45 = vmax.f32 %v453_v38, 0.0 }
  0xf2   : > { %v570_v44 = vmax.f32 %v464_v40, 0.0 }
  0xf3   : > { %v568_v46 = vmax.f32 %v456_v42, 0.0 }
  0xf4   : > { %v598_v47 = vpack.c.bf16 %v570_v44, %v569_v43 }
  0xf5   : > { %v597_v48 = vpack.c.bf16 %v568_v46, %v567_v45  ;;  %v1505_v49 = vpop.f32.mrb[8].mxu0 }
  0xf6   : > { %v477_v50 = vadd.f32 %v1505_v49, %v1687_v20  ;;  %v468_v51 = vpop.f32.mrb[9].mxu0 }
  0xf7   : > { %v469_v52 = vadd.f32 %v1687_v20, %v468_v51  ;;  %v1506_v53 = vpop.f32.mrb[10].mxu0  ;;  %1535 = vmatprep.mubr.msk.bf16.mxu1 %vm634_vm2, %v597_v48 }
  0xf8   : > { %v480_v54 = vadd.f32 %v1506_v53, %v1687_v20  ;;  %v471_v55 = vpop.f32.mrb[11].mxu0  ;;  %1536 = vmatmul.mubr.msk.bf16.gmra.mrb[4].mxu1 %vm634_vm2, %v598_v47  ;;  %v573_v57 = vmax.f32 %v477_v50, 0.0 }
  0xf9   : > { %v472_v56 = vadd.f32 %v1687_v20, %v471_v55  ;;  %v571_v59 = vmax.f32 %v469_v52, 0.0 }
  0xfa   : > { %v574_v58 = vmax.f32 %v480_v54, 0.0 }
  0xfb   : > { %v572_v60 = vmax.f32 %v472_v56, 0.0 }
  0xfc   : > { %v600_v61 = vpack.c.bf16 %v574_v58, %v573_v57 }
  0xfd   : > { %v599_v62 = vpack.c.bf16 %v572_v60, %v571_v59  ;;  %v1509_v63 = vpop.f32.mrb[12].mxu0 }
  0xfe   : > { %v493_v0 = vadd.f32 %v1509_v63, %v1687_v20  ;;  %v484_v1 = vpop.f32.mrb[13].mxu0 }
  0xff   : > { %v485_v2 = vadd.f32 %v1687_v20, %v484_v1  ;;  %v1510_v3 = vpop.f32.mrb[14].mxu0  ;;  %1539 = vmatprep.mubr.msk.bf16.mxu1 %vm634_vm2, %v599_v62 }
 0x100   : > { %v496_v4 = vadd.f32 %v1510_v3, %v1687_v20  ;;  %v487_v5 = vpop.f32.mrb[15].mxu0  ;;  %1540 = vmatmul.mubr.msk.bf16.gmra.mrb[8].mxu1 %vm634_vm2, %v600_v61  ;;  %v577_v7 = vmax.f32 %v493_v0, 0.0 }
 0x101   : > { %v488_v6 = vadd.f32 %v1687_v20, %v487_v5  ;;  %v575_v9 = vmax.f32 %v485_v2, 0.0 }
 0x102   : > { %v578_v8 = vmax.f32 %v496_v4, 0.0 }
 0x103   : > { %v576_v10 = vmax.f32 %v488_v6, 0.0  ;;  %v1740_v6 = vld [vmem:[%s1853_s4] ss:$0 sm:$0xff] }
 0x104   : > { %v602_v11 = vpack.c.bf16 %v578_v8, %v577_v7 }
 0x105   : > { %v601_v12 = vpack.c.bf16 %v576_v10, %v575_v9  ;;  %v1513_v13 = vpop.f32.mrb[16].mxu0 }
 0x106   : > { %v509_v14 = vadd.f32 %v1513_v13, %v1687_v20  ;;  %v500_v15 = vpop.f32.mrb[17].mxu0 }
 0x107   : > { %v501_v16 = vadd.f32 %v1687_v20, %v500_v15  ;;  %v1514_v17 = vpop.f32.mrb[18].mxu0  ;;  %1543 = vmatprep.mubr.msk.bf16.mxu1 %vm634_vm2, %v601_v12 }
 0x108   : > { %v512_v18 = vadd.f32 %v1514_v17, %v1687_v20  ;;  %v503_v19 = vpop.f32.mrb[19].mxu0  ;;  %1544 = vmatmul.mubr.msk.bf16.gmra.mrb[12].mxu1 %vm634_vm2, %v602_v11  ;;  %v581_v22 = vmax.f32 %v509_v14, 0.0 }
 0x109   : > { %v504_v21 = vadd.f32 %v1687_v20, %v503_v19  ;;  %v579_v24 = vmax.f32 %v501_v16, 0.0 }
 0x10a   : > { %v582_v23 = vmax.f32 %v512_v18, 0.0 }
 0x10b   : > { %v580_v25 = vmax.f32 %v504_v21, 0.0 }
 0x10c   : > { %v604_v26 = vpack.c.bf16 %v582_v23, %v581_v22 }
 0x10d   : > { %v603_v27 = vpack.c.bf16 %v580_v25, %v579_v24  ;;  %v1517_v28 = vpop.f32.mrb[20].mxu0 }
 0x10e   : > { %v525_v29 = vadd.f32 %v1517_v28, %v1687_v20  ;;  %v516_v30 = vpop.f32.mrb[21].mxu0 }
 0x10f   : > { %v517_v31 = vadd.f32 %v1687_v20, %v516_v30  ;;  %v1518_v32 = vpop.f32.mrb[22].mxu0  ;;  %1547 = vmatprep.mubr.msk.bf16.mxu1 %vm634_vm2, %v603_v27 }
 0x110   : > { %v528_v33 = vadd.f32 %v1518_v32, %v1687_v20  ;;  %v519_v34 = vpop.f32.mrb[23].mxu0  ;;  %1548 = vmatmul.mubr.msk.bf16.gmra.mrb[16].mxu1 %vm634_vm2, %v604_v26  ;;  %v585_v36 = vmax.f32 %v525_v29, 0.0 }
 0x111   : > { %v520_v35 = vadd.f32 %v1687_v20, %v519_v34  ;;  %v583_v38 = vmax.f32 %v517_v31, 0.0 }
 0x112   : > { %v586_v37 = vmax.f32 %v528_v33, 0.0 }
 0x113   : > { %v584_v39 = vmax.f32 %v520_v35, 0.0 }
 0x114   : > { %v606_v40 = vpack.c.bf16 %v586_v37, %v585_v36 }
 0x115   : > { %v605_v41 = vpack.c.bf16 %v584_v39, %v583_v38  ;;  %v1521_v42 = vpop.f32.mrb[24].mxu0 }
 0x116   : > { %v541_v43 = vadd.f32 %v1521_v42, %v1687_v20  ;;  %v532_v44 = vpop.f32.mrb[25].mxu0 }
 0x117   : > { %v533_v45 = vadd.f32 %v1687_v20, %v532_v44  ;;  %v1522_v46 = vpop.f32.mrb[26].mxu0  ;;  %1551 = vmatprep.mubr.msk.bf16.mxu1 %vm634_vm2, %v605_v41 }
 0x118   : > { %v544_v47 = vadd.f32 %v1522_v46, %v1687_v20  ;;  %v535_v48 = vpop.f32.mrb[27].mxu0  ;;  %1552 = vmatmul.mubr.msk.bf16.gmra.mrb[20].mxu1 %vm634_vm2, %v606_v40  ;;  %v589_v50 = vmax.f32 %v541_v43, 0.0 }
 0x119   : > { %v536_v49 = vadd.f32 %v1687_v20, %v535_v48  ;;  %v587_v52 = vmax.f32 %v533_v45, 0.0 }
 0x11a   : > { %v590_v51 = vmax.f32 %v544_v47, 0.0 }
 0x11b   : > { %v588_v53 = vmax.f32 %v536_v49, 0.0 }
 0x11c   : > { %v608_v54 = vpack.c.bf16 %v590_v51, %v589_v50 }
 0x11d   : > { %v607_v55 = vpack.c.bf16 %v588_v53, %v587_v52  ;;  %v1525_v56 = vpop.f32.mrb[28].mxu0 }
 0x11e   : > { %v557_v57 = vadd.f32 %v1525_v56, %v1687_v20  ;;  %v548_v58 = vpop.f32.mrb[29].mxu0 }
 0x11f   : > { %v549_v59 = vadd.f32 %v1687_v20, %v548_v58  ;;  %v1526_v60 = vpop.f32.mrb[30].mxu0  ;;  %1555 = vmatprep.mubr.msk.bf16.mxu1 %vm634_vm2, %v607_v55 }
 0x120   : > { %v560_v61 = vadd.f32 %v1526_v60, %v1687_v20  ;;  %v551_v62 = vpop.f32.mrb[31].mxu0  ;;  %1556 = vmatmul.mubr.msk.bf16.gmra.mrb[24].mxu1 %vm634_vm2, %v608_v54  ;;  %v593_v0 = vmax.f32 %v557_v57, 0.0 }
 0x121   : > { %v552_v63 = vadd.f32 %v1687_v20, %v551_v62  ;;  %v591_v2 = vmax.f32 %v549_v59, 0.0 }
 0x122   : > { %v594_v1 = vmax.f32 %v560_v61, 0.0 }
 0x123   : > { %v592_v3 = vmax.f32 %v552_v63, 0.0 }
 0x124   : > { %v610_v4 = vpack.c.bf16 %v594_v1, %v593_v0 }
 0x125   : > { %v609_v5 = vpack.c.bf16 %v592_v3, %v591_v2 }
 0x127   : > { %1559 = vmatprep.mubr.msk.bf16.mxu1 %vm634_vm2, %v609_v5 }
 0x128   : > { %1560 = vmatmul.mubr.msk.bf16.gmra.mrb[28].mxu1 %vm634_vm2, %v610_v4 }
 0x1c3   : > { %v1533_v7 = vpop.f32.mrb[0].mxu1 }
 0x1c4   : > { %v726_v8 = vadd.f32 %v1533_v7, %v1740_v6  ;;  %v717_v9 = vpop.f32.mrb[1].mxu1 }
 0x1c5   : > { %v718_v20 = vadd.f32 %v1740_v6, %v717_v9  ;;  %v1534_v10 = vpop.f32.mrb[2].mxu1 }
 0x1c6   : > { %v846_v11 = vmax.f32 %v726_v8, 0.0  ;;  %v729_v12 = vadd.f32 %v1534_v10, %v1740_v6  ;;  %v720_v13 = vpop.f32.mrb[3].mxu1 }
 0x1c7   : > { %v844_v14 = vmax.f32 %v718_v20, 0.0  ;;  %v721_v15 = vadd.f32 %v1740_v6, %v720_v13 }
 0x1c8   : > { %v888_v16 = vrot.slane %v846_v11, 4  ;;  %v847_v17 = vmax.f32 %v729_v12, 0.0 }
 0x1c9   : > { %v876_v18 = vrot.slane %v844_v14, 4  ;;  %v845_v19 = vmax.f32 %v721_v15, 0.0 }
 0x1ca   : > { %v889_v21 = vmax.f32 %v846_v11, %v888_v16  ;;  %v894_v22 = vrot.slane %v847_v17, 4 }
 0x1cb   : > { %v877_v23 = vmax.f32 %v844_v14, %v876_v18  ;;  %v882_v24 = vrot.slane %v845_v19, 4  ;;  %v1537_v25 = vpop.f32.mrb[4].mxu1 }
 0x1cc   : > { %v890_v26 = vrot.slane %v889_v21, 2  ;;  %v895_v27 = vmax.f32 %v847_v17, %v894_v22  ;;  %v742_v28 = vadd.f32 %v1537_v25, %v1740_v6  ;;  %v733_v29 = vpop.f32.mrb[5].mxu1 }
 0x1cd   : > { %v878_v30 = vrot.slane %v877_v23, 2  ;;  %v883_v31 = vmax.f32 %v845_v19, %v882_v24  ;;  %v734_v32 = vadd.f32 %v1740_v6, %v733_v29  ;;  %v1538_v33 = vpop.f32.mrb[6].mxu1 }
 0x1ce   : > { %v891_v34 = vmax.f32 %v889_v21, %v890_v26  ;;  %v896_v35 = vrot.slane %v895_v27, 2  ;;  %v850_v36 = vmax.f32 %v742_v28, 0.0  ;;  %v745_v37 = vadd.f32 %v1538_v33, %v1740_v6  ;;  %v736_v38 = vpop.f32.mrb[7].mxu1 }
 0x1cf   : > { %v879_v39 = vmax.f32 %v877_v23, %v878_v30  ;;  %v884_v40 = vrot.slane %v883_v31, 2  ;;  %v848_v41 = vmax.f32 %v734_v32, 0.0  ;;  %v737_v42 = vadd.f32 %v1740_v6, %v736_v38 }
 0x1d0   : > { %v892_v43 = vrot.slane %v891_v34, 1  ;;  %v897_v44 = vmax.f32 %v895_v27, %v896_v35  ;;  %v912_v45 = vrot.slane %v850_v36, 4  ;;  %v851_v46 = vmax.f32 %v745_v37, 0.0 }
 0x1d1   : > { %v880_v47 = vrot.slane %v879_v39, 1  ;;  %v885_v48 = vmax.f32 %v883_v31, %v884_v40  ;;  %v900_v49 = vrot.slane %v848_v41, 4  ;;  %v849_v50 = vmax.f32 %v737_v42, 0.0 }
 0x1d2   : > { %v893_v51 = vmax.f32 %v891_v34, %v892_v43  ;;  %v898_v52 = vrot.slane %v897_v44, 1  ;;  %v913_v53 = vmax.f32 %v850_v36, %v912_v45  ;;  %v918_v54 = vrot.slane %v851_v46, 4 }
 0x1d3   : > { %v881_v55 = vmax.f32 %v879_v39, %v880_v47  ;;  %v886_v56 = vrot.slane %v885_v48, 1  ;;  %v901_v57 = vmax.f32 %v848_v41, %v900_v49  ;;  %v906_v58 = vrot.slane %v849_v50, 4  ;;  %v1541_v59 = vpop.f32.mrb[8].mxu1 }
 0x1d4   : > { %v1428_v60 = vpack.c.bf16 %v893_v51, %v893_v51  ;;  %v899_v61 = vmax.f32 %v897_v44, %v898_v52  ;;  %v914_v62 = vrot.slane %v913_v53, 2  ;;  %v919_v63 = vmax.f32 %v851_v46, %v918_v54  ;;  %v749_v0 = vpop.f32.mrb[9].mxu1 }
 0x1d5   : > { %v1426_v1 = vpack.c.bf16 %v881_v55, %v881_v55  ;;  %v887_v2 = vmax.f32 %v885_v48, %v886_v56  ;;  %v902_v3 = vrot.slane %v901_v57, 2  ;;  %v907_v4 = vmax.f32 %v849_v50, %v906_v58  ;;  %v1542_v5 = vpop.f32.mrb[10].mxu1 }
 0x1d6   : > { %v1198_v7 = vunpack.c.l.b16 %v1428_v60  ;;  %v1429_v8 = vpack.c.bf16 %v899_v61, %v899_v61  ;;  %v915_v9 = vmax.f32 %v913_v53, %v914_v62  ;;  %v920_v20 = vrot.slane %v919_v63, 2  ;;  %v752_v10 = vpop.f32.mrb[11].mxu1 }
 0x1d7   : > { %v1196_v11 = vunpack.c.l.b16 %v1426_v1  ;;  %v1427_v12 = vpack.c.bf16 %v887_v2, %v887_v2  ;;  %v903_v13 = vmax.f32 %v901_v57, %v902_v3  ;;  %v908_v14 = vrot.slane %v907_v4, 2 }
 0x1d8   : > { %v1199_v15 = vunpack.c.l.b16 %v1429_v8  ;;  %v916_v16 = vrot.slane %v915_v9, 1  ;;  %v921_v17 = vmax.f32 %v919_v63, %v920_v20  ;;  %v758_v18 = vadd.f32 %v1541_v59, %v1740_v6 }
 0x1d9   : > { %v1197_v19 = vunpack.c.l.b16 %v1427_v12  ;;  %v904_v21 = vrot.slane %v903_v13, 1  ;;  %v909_v22 = vmax.f32 %v907_v4, %v908_v14  ;;  %v750_v23 = vadd.f32 %v1740_v6, %v749_v0 }
 0x1da   : > { %v917_v24 = vmax.f32 %v915_v9, %v916_v16  ;;  %v922_v25 = vrot.slane %v921_v17, 1  ;;  %v854_v26 = vmax.f32 %v758_v18, 0.0  ;;  %v761_v27 = vadd.f32 %v1542_v5, %v1740_v6 }
 0x1db   : > { %v1229_v28 = vsel %vm1228_vm3, %v1197_v19, %v1196_v11  ;;  %v905_v29 = vmax.f32 %v903_v13, %v904_v21  ;;  %v910_v30 = vrot.slane %v909_v22, 1  ;;  %v852_v31 = vmax.f32 %v750_v23, 0.0  ;;  %v1545_v32 = vpop.f32.mrb[12].mxu1 }
 0x1dc   : > { %v1231_v33 = vsel %vm1230_vm4, %v1198_v7, %v1229_v28  ;;  %v1432_v34 = vpack.c.bf16 %v917_v24, %v917_v24  ;;  %v923_v35 = vmax.f32 %v921_v17, %v922_v25  ;;  %v936_v36 = vrot.slane %v854_v26, 4  ;;  %v765_v37 = vpop.f32.mrb[13].mxu1 }
 0x1dd   : > { %v1430_v38 = vpack.c.bf16 %v905_v29, %v905_v29  ;;  %v1233_v39 = vsel %vm1232_vm5, %v1199_v15, %v1231_v33  ;;  %v911_v40 = vmax.f32 %v909_v22, %v910_v30  ;;  %v924_v41 = vrot.slane %v852_v31, 4  ;;  %v1546_v42 = vpop.f32.mrb[14].mxu1 }
 0x1de   : > { %v1202_v43 = vunpack.c.l.b16 %v1432_v34  ;;  %v1433_v44 = vpack.c.bf16 %v923_v35, %v923_v35  ;;  %v937_v45 = vmax.f32 %v854_v26, %v936_v36  ;;  %v855_v46 = vmax.f32 %v761_v27, 0.0  ;;  %v768_v47 = vpop.f32.mrb[15].mxu1 }
 0x1df   : > { %v1200_v48 = vunpack.c.l.b16 %v1430_v38  ;;  %v1431_v49 = vpack.c.bf16 %v911_v40, %v911_v40  ;;  %v925_v50 = vmax.f32 %v852_v31, %v924_v41  ;;  %v753_v51 = vadd.f32 %v1740_v6, %v752_v10 }
 0x1e0   : > { %v1203_v52 = vunpack.c.l.b16 %v1433_v44  ;;  %v938_v53 = vrot.slane %v937_v45, 2  ;;  %v942_v54 = vrot.slane %v855_v46, 4  ;;  %v774_v55 = vadd.f32 %v1545_v32, %v1740_v6 }
 0x1e1   : > { %v1235_v56 = vsel %vm1234_vm6, %v1200_v48, %v1233_v39  ;;  %v1201_v57 = vunpack.c.l.b16 %v1431_v49  ;;  %v926_v58 = vrot.slane %v925_v50, 2  ;;  %v853_v59 = vmax.f32 %v753_v51, 0.0 }
 0x1e2   : > { %v939_v60 = vmax.f32 %v937_v45, %v938_v53  ;;  %v943_v61 = vmax.f32 %v855_v46, %v942_v54  ;;  %v858_v62 = vmax.f32 %v774_v55, 0.0  ;;  %v766_v63 = vadd.f32 %v1740_v6, %v765_v37 }
 0x1e3   : > { %v1237_v0 = vsel %vm1236_vm7, %v1201_v57, %v1235_v56  ;;  %v927_v1 = vmax.f32 %v925_v50, %v926_v58  ;;  %v930_v2 = vrot.slane %v853_v59, 4  ;;  %v777_v3 = vadd.f32 %v1546_v42, %v1740_v6  ;;  %v1549_v4 = vpop.f32.mrb[16].mxu1 }
 0x1e4   : > { %v1239_v5 = vsel %vm1238_vm8, %v1202_v43, %v1237_v0  ;;  %v940_v7 = vrot.slane %v939_v60, 1  ;;  %v944_v8 = vrot.slane %v943_v61, 2  ;;  %v960_v9 = vrot.slane %v858_v62, 4  ;;  %v781_v20 = vpop.f32.mrb[17].mxu1 }
 0x1e5   : > { %v1241_v10 = vsel %vm1240_vm9, %v1203_v52, %v1239_v5  ;;  %v928_v11 = vrot.slane %v927_v1, 1  ;;  %v931_v12 = vmax.f32 %v853_v59, %v930_v2  ;;  %v856_v13 = vmax.f32 %v766_v63, 0.0  ;;  %v1550_v14 = vpop.f32.mrb[18].mxu1 }
 0x1e6   : > { %v1263_v15 = vpack.c.b16 %v1241_v10, %v1241_v10  ;;  %v941_v16 = vmax.f32 %v939_v60, %v940_v7  ;;  %v945_v17 = vmax.f32 %v943_v61, %v944_v8  ;;  %v961_v18 = vmax.f32 %v858_v62, %v960_v9  ;;  %v1780_v19 = vpop.f32.mrb[19].mxu1 }
 0x1e7   : > { %v929_v21 = vmax.f32 %v927_v1, %v928_v11  ;;  %v932_v22 = vrot.slane %v931_v12, 2  ;;  %v948_v23 = vrot.slane %v856_v13, 4  ;;  %v859_v24 = vmax.f32 %v777_v3, 0.0 }
 0x1e8   : > { %1271 = vst [vmem:[%s1777_s14] sm:$0xf] %v1263_v15  ;;  %v1436_v25 = vpack.c.bf16 %v941_v16, %v941_v16  ;;  %v946_v26 = vrot.slane %v945_v17, 1  ;;  %v962_v27 = vrot.slane %v961_v18, 2  ;;  %v769_v28 = vadd.f32 %v1740_v6, %v768_v47 }
 0x1e9   : > { %v933_v29 = vmax.f32 %v931_v12, %v932_v22  ;;  %v949_v30 = vmax.f32 %v856_v13, %v948_v23  ;;  %v966_v31 = vrot.slane %v859_v24, 4  ;;  %v1434_v32 = vpack.c.bf16 %v929_v21, %v929_v21 }
 0x1ea   : > { %v947_v33 = vmax.f32 %v945_v17, %v946_v26  ;;  %v963_v34 = vmax.f32 %v961_v18, %v962_v27  ;;  %v857_v35 = vmax.f32 %v769_v28, 0.0  ;;  %v1206_v40 = vunpack.c.l.b16 %v1436_v25 }
 0x1eb   : > { %v934_v36 = vrot.slane %v933_v29, 1  ;;  %v950_v37 = vrot.slane %v949_v30, 2  ;;  %v967_v38 = vmax.f32 %v859_v24, %v966_v31  ;;  %v1553_v39 = vpop.f32.mrb[20].mxu1  ;;  %v790_v43 = vadd.f32 %v1549_v4, %v1740_v6 }
 0x1ec   : > { %v964_v41 = vrot.slane %v963_v34, 1  ;;  %v954_v42 = vrot.slane %v857_v35, 4  ;;  %v797_v44 = vpop.f32.mrb[21].mxu1  ;;  %v782_v48 = vadd.f32 %v1740_v6, %v781_v20  ;;  %v1204_v50 = vunpack.c.l.b16 %v1434_v32 }
 0x1ed   : > { %v935_v45 = vmax.f32 %v933_v29, %v934_v36  ;;  %v951_v46 = vmax.f32 %v949_v30, %v950_v37  ;;  %v968_v47 = vrot.slane %v967_v38, 2  ;;  %v1554_v49 = vpop.f32.mrb[22].mxu1  ;;  %v1437_v51 = vpack.c.bf16 %v947_v33, %v947_v33 }
 0x1ee   : > { %v955_v52 = vmax.f32 %v857_v35, %v954_v42  ;;  %v862_v53 = vmax.f32 %v790_v43, 0.0  ;;  %v1786_v54 = vpop.f32.mrb[23].mxu1  ;;  %v860_v58 = vmax.f32 %v782_v48, 0.0  ;;  %v965_v59 = vmax.f32 %v963_v34, %v964_v41 }
 0x1ef   : > { %v1435_v55 = vpack.c.bf16 %v935_v45, %v935_v45  ;;  %v952_v56 = vrot.slane %v951_v46, 1  ;;  %v969_v57 = vmax.f32 %v967_v38, %v968_v47  ;;  %v793_v62 = vadd.f32 %v1550_v14, %v1740_v6 }
 0x1f0   : > { %v956_v60 = vrot.slane %v955_v52, 2  ;;  %v984_v61 = vrot.slane %v862_v53, 4  ;;  %v972_v2 = vrot.slane %v860_v58, 4  ;;  %v1207_v3 = vunpack.c.l.b16 %v1437_v51 }
 0x1f1   : > { %v1205_v63 = vunpack.c.l.b16 %v1435_v55  ;;  %v953_v0 = vmax.f32 %v951_v46, %v952_v56  ;;  %v970_v1 = vrot.slane %v969_v57, 1  ;;  %v863_v7 = vmax.f32 %v793_v62, 0.0 }
 0x1f2   : > { %v957_v4 = vmax.f32 %v955_v52, %v956_v60  ;;  %v985_v5 = vmax.f32 %v862_v53, %v984_v61  ;;  %v973_v10 = vmax.f32 %v860_v58, %v972_v2  ;;  %v1440_v17 = vpack.c.bf16 %v965_v59, %v965_v59 }
 0x1f3   : > { %v1242_v8 = vsel %vm1228_vm3, %v1205_v63, %v1204_v50  ;;  %v1438_v9 = vpack.c.bf16 %v953_v0, %v953_v0  ;;  %v971_v20 = vmax.f32 %v969_v57, %v970_v1  ;;  %v1557_v11 = vpop.f32.mrb[24].mxu1  ;;  %v990_v16 = vrot.slane %v863_v7, 4 }
 0x1f4   : > { %v1243_v12 = vsel %vm1230_vm4, %v1206_v40, %v1242_v8  ;;  %v958_v13 = vrot.slane %v957_v4, 1  ;;  %v986_v15 = vrot.slane %v985_v5, 2  ;;  %v813_v14 = vpop.f32.mrb[25].mxu1  ;;  %v974_v22 = vrot.slane %v973_v10, 2 }
 0x1f5   : > { %v1208_v18 = vunpack.c.l.b16 %v1438_v9  ;;  %v1244_v21 = vsel %vm1232_vm5, %v1207_v3, %v1243_v12  ;;  %v1792_v23 = vpop.f32.mrb[26].mxu1  ;;  %v991_v26 = vmax.f32 %v863_v7, %v990_v16  ;;  %v785_v27 = vadd.f32 %v1740_v6, %v1780_v19 }
 0x1f6   : > { %v959_v24 = vmax.f32 %v957_v4, %v958_v13  ;;  %v987_v25 = vmax.f32 %v985_v5, %v986_v15  ;;  %v1796_v28 = vpop.f32.mrb[27].mxu1  ;;  %v1441_v30 = vpack.c.bf16 %v971_v20, %v971_v20  ;;  %v975_v31 = vmax.f32 %v973_v10, %v974_v22 }
 0x1f7   : > { %v1245_v29 = vsel %vm1234_vm6, %v1208_v18, %v1244_v21  ;;  %v806_v32 = vadd.f32 %v1553_v39, %v1740_v6  ;;  %v992_v35 = vrot.slane %v991_v26, 2  ;;  %v861_v36 = vmax.f32 %v785_v27, 0.0 }
 0x1f8   : > { %v1439_v33 = vpack.c.bf16 %v959_v24, %v959_v24  ;;  %v988_v34 = vrot.slane %v987_v25, 1  ;;  %v1210_v37 = vunpack.c.l.b16 %v1440_v17  ;;  %v798_v40 = vadd.f32 %v1740_v6, %v797_v44 }
 0x1f9   : > { %v866_v38 = vmax.f32 %v806_v32, 0.0  ;;  %v809_v41 = vadd.f32 %v1554_v49, %v1740_v6  ;;  %v976_v19 = vrot.slane %v975_v31, 1  ;;  %v993_v43 = vmax.f32 %v991_v26, %v992_v35 }
 0x1fa   : > { %v1209_v42 = vunpack.c.l.b16 %v1439_v33  ;;  %v978_v45 = vrot.slane %v861_v36, 4  ;;  %v1211_v46 = vunpack.c.l.b16 %v1441_v30  ;;  %v989_v47 = vmax.f32 %v987_v25, %v988_v34 }
 0x1fb   : > { %v1008_v48 = vrot.slane %v866_v38, 4  ;;  %v864_v50 = vmax.f32 %v798_v40, 0.0  ;;  %v1802_v51 = vpop.f32.mrb[28].mxu1  ;;  %v994_v52 = vrot.slane %v993_v43, 1  ;;  %v867_v55 = vmax.f32 %v809_v41, 0.0 }
 0x1fc   : > { %v1246_v39 = vsel %vm1236_vm7, %v1209_v42, %v1245_v29  ;;  %v979_v53 = vmax.f32 %v861_v36, %v978_v45  ;;  %v1805_v56 = vpop.f32.mrb[29].mxu1  ;;  %v977_v60 = vmax.f32 %v975_v31, %v976_v19  ;;  %v1444_v3 = vpack.c.bf16 %v989_v47, %v989_v47 }
 0x1fd   : > { %v1247_v44 = vsel %vm1238_vm8, %v1210_v37, %v1246_v39  ;;  %v1009_v49 = vmax.f32 %v866_v38, %v1008_v48  ;;  %v996_v57 = vrot.slane %v864_v50, 4  ;;  %v1808_v58 = vpop.f32.mrb[30].mxu1  ;;  %v995_v0 = vmax.f32 %v993_v43, %v994_v52 }
 0x1fe   : > { %v1248_v59 = vsel %vm1240_vm9, %v1211_v46, %v1247_v44  ;;  %v980_v61 = vrot.slane %v979_v53, 2  ;;  %v1811_v62 = vpop.f32.mrb[31].mxu1  ;;  %v1014_v5 = vrot.slane %v867_v55, 4  ;;  %v801_v7 = vadd.f32 %v1740_v6, %v1786_v54 }
 0x1ff   : > { %v1264_v63 = vpack.c.b16 %v1248_v59, %v1248_v59  ;;  %v1010_v1 = vrot.slane %v1009_v49, 2  ;;  %v997_v2 = vmax.f32 %v864_v50, %v996_v57  ;;  %v822_v20 = vadd.f32 %v1557_v11, %v1740_v6 }
 0x200   : > { %v981_v4 = vmax.f32 %v979_v53, %v980_v61  ;;  %v814_v10 = vadd.f32 %v1740_v6, %v813_v14  ;;  %v1442_v12 = vpack.c.bf16 %v977_v60, %v977_v60  ;;  %v1015_v15 = vmax.f32 %v867_v55, %v1014_v5 }
 0x201   : > { %1272 = vst [vmem:[%s1777_s14 + $0x4] sm:$0xf] %v1264_v63  ;;  %v1011_v8 = vmax.f32 %v1009_v49, %v1010_v1  ;;  %v998_v9 = vrot.slane %v997_v2, 2  ;;  %v865_v16 = vmax.f32 %v801_v7, 0.0  ;;  %v1445_v17 = vpack.c.bf16 %v995_v0, %v995_v0 }
 0x202   : > { %v982_v13 = vrot.slane %v981_v4, 1  ;;  %v870_v21 = vmax.f32 %v822_v20, 0.0  ;;  %v868_v22 = vmax.f32 %v814_v10, 0.0  ;;  %v1016_v25 = vrot.slane %v1015_v15, 2 }
 0x203   : > { %v999_v18 = vmax.f32 %v997_v2, %v998_v9  ;;  %v1002_v26 = vrot.slane %v865_v16, 4  ;;  %v825_v54 = vadd.f32 %v1792_v23, %v1740_v6  ;;  %v1012_v27 = vrot.slane %v1011_v8, 1 }
 0x204   : > { %v983_v24 = vmax.f32 %v981_v4, %v982_v13  ;;  %v1032_v30 = vrot.slane %v870_v21, 4  ;;  %v1020_v11 = vrot.slane %v868_v22, 4  ;;  %v1017_v14 = vmax.f32 %v1015_v15, %v1016_v25 }
 0x205   : > { %v1000_v29 = vrot.slane %v999_v18, 1  ;;  %v1003_v32 = vmax.f32 %v865_v16, %v1002_v26  ;;  %v871_v33 = vmax.f32 %v825_v54, 0.0  ;;  %v1212_v34 = vunpack.c.l.b16 %v1442_v12 }
 0x206   : > { %v1443_v31 = vpack.c.bf16 %v983_v24, %v983_v24  ;;  %v1033_v36 = vmax.f32 %v870_v21, %v1032_v30  ;;  %v1021_v37 = vmax.f32 %v868_v22, %v1020_v11  ;;  %v1018_v40 = vrot.slane %v1017_v14, 1 }
 0x207   : > { %v1001_v35 = vmax.f32 %v999_v18, %v1000_v29  ;;  %v1004_v41 = vrot.slane %v1003_v32, 2  ;;  %v1038_v42 = vrot.slane %v871_v33, 4  ;;  %v1214_v19 = vunpack.c.l.b16 %v1444_v3 }
 0x208   : > { %v1213_v38 = vunpack.c.l.b16 %v1443_v31  ;;  %v1215_v43 = vunpack.c.l.b16 %v1445_v17  ;;  %v1013_v45 = vmax.f32 %v1011_v8, %v1012_v27  ;;  %v1022_v48 = vrot.slane %v1021_v37, 2 }
 0x209   : > { %v1446_v23 = vpack.c.bf16 %v1001_v35, %v1001_v35  ;;  %v1005_v47 = vmax.f32 %v1003_v32, %v1004_v41  ;;  %v1039_v50 = vmax.f32 %v871_v33, %v1038_v42  ;;  %v1019_v53 = vmax.f32 %v1017_v14, %v1018_v40 }
 0x20a   : > { %v1249_v46 = vsel %vm1228_vm3, %v1213_v38, %v1212_v34  ;;  %v1034_v55 = vrot.slane %v1033_v36, 2  ;;  %v1448_v59 = vpack.c.bf16 %v1013_v45, %v1013_v45  ;;  %v817_v61 = vadd.f32 %v1740_v6, %v1796_v28 }
 0x20b   : > { %v1250_v39 = vsel %vm1230_vm4, %v1214_v19, %v1249_v46  ;;  %v1216_v52 = vunpack.c.l.b16 %v1446_v23  ;;  %v1006_v49 = vrot.slane %v1005_v47, 1  ;;  %v1040_v57 = vrot.slane %v1039_v50, 2 }
 0x20c   : > { %v1251_v44 = vsel %vm1232_vm5, %v1215_v43, %v1250_v39  ;;  %v1023_v0 = vmax.f32 %v1021_v37, %v1022_v48  ;;  %v838_v1 = vadd.f32 %v1802_v51, %v1740_v6  ;;  %v1449_v2 = vpack.c.bf16 %v1019_v53, %v1019_v53 }
 0x20d   : > { %v1252_v60 = vsel %vm1234_vm6, %v1216_v52, %v1251_v44  ;;  %v1007_v63 = vmax.f32 %v1005_v47, %v1006_v49  ;;  %v1035_v3 = vmax.f32 %v1033_v36, %v1034_v55  ;;  %v869_v4 = vmax.f32 %v817_v61, 0.0 }
 0x20e   : > { %v830_v5 = vadd.f32 %v1740_v6, %v1805_v56  ;;  %v1041_v8 = vmax.f32 %v1039_v50, %v1040_v57  ;;  %v874_v9 = vmax.f32 %v838_v1, 0.0  ;;  %v841_v20 = vadd.f32 %v1808_v58, %v1740_v6 }
 0x20f   : > { %v1447_v7 = vpack.c.bf16 %v1007_v63, %v1007_v63  ;;  %v1218_v10 = vunpack.c.l.b16 %v1448_v59  ;;  %v1026_v12 = vrot.slane %v869_v4, 4  ;;  %v1024_v15 = vrot.slane %v1023_v0, 1 }
 0x210   : > { %v872_v28 = vmax.f32 %v830_v5, 0.0  ;;  %v1056_v16 = vrot.slane %v874_v9, 4  ;;  %v875_v17 = vmax.f32 %v841_v20, 0.0  ;;  %v1219_v51 = vunpack.c.l.b16 %v1449_v2 }
 0x211   : > { %v1217_v13 = vunpack.c.l.b16 %v1447_v7  ;;  %v1036_v18 = vrot.slane %v1035_v3, 1  ;;  %v1027_v21 = vmax.f32 %v869_v4, %v1026_v12  ;;  %v1042_v56 = vrot.slane %v1041_v8, 1 }
 0x212   : > { %v1044_v22 = vrot.slane %v872_v28, 4  ;;  %v1057_v25 = vmax.f32 %v874_v9, %v1056_v16  ;;  %v1062_v26 = vrot.slane %v875_v17, 4  ;;  %v833_v29 = vadd.f32 %v1740_v6, %v1811_v62 }
 0x213   : > { %v1253_v24 = vsel %vm1236_vm7, %v1217_v13, %v1252_v60  ;;  %v1028_v58 = vrot.slane %v1027_v21, 2  ;;  %v1025_v11 = vmax.f32 %v1023_v0, %v1024_v15  ;;  %v1037_v36 = vmax.f32 %v1035_v3, %v1036_v18 }
 0x214   : > { %v1254_v54 = vsel %vm1238_vm8, %v1218_v10, %v1253_v24  ;;  %v1045_v27 = vmax.f32 %v872_v28, %v1044_v22  ;;  %v1058_v31 = vrot.slane %v1057_v25, 2  ;;  %v1063_v14 = vmax.f32 %v875_v17, %v1062_v26 }
 0x215   : > { %v1255_v30 = vsel %vm1240_vm9, %v1219_v51, %v1254_v54  ;;  %v1029_v33 = vmax.f32 %v1027_v21, %v1028_v58  ;;  %v873_v35 = vmax.f32 %v833_v29, 0.0  ;;  %v1043_v37 = vmax.f32 %v1041_v8, %v1042_v56 }
 0x216   : > { %v1265_v32 = vpack.c.b16 %v1255_v30, %v1255_v30  ;;  %v1046_v34 = vrot.slane %v1045_v27, 2  ;;  %v1059_v38 = vmax.f32 %v1057_v25, %v1058_v31  ;;  %v1064_v40 = vrot.slane %v1063_v14, 2 }
 0x217   : > { %v1030_v41 = vrot.slane %v1029_v33, 1  ;;  %v1050_v19 = vrot.slane %v873_v35, 4  ;;  %v1450_v45 = vpack.c.bf16 %v1025_v11, %v1025_v11  ;;  %v1452_v46 = vpack.c.bf16 %v1037_v36, %v1037_v36 }
 0x218   : > { %1273 = vst [vmem:[%s1777_s14 + $0x8] sm:$0xf] %v1265_v32  ;;  %v1047_v42 = vmax.f32 %v1045_v27, %v1046_v34  ;;  %v1065_v43 = vmax.f32 %v1063_v14, %v1064_v40  ;;  %v1453_v47 = vpack.c.bf16 %v1043_v37, %v1043_v37  ;;  %v1060_v48 = vrot.slane %v1059_v38, 1 }
 0x219   : > { %v1031_v6 = vmax.f32 %v1029_v33, %v1030_v41  ;;  %v1051_v23 = vmax.f32 %v873_v35, %v1050_v19  ;;  %v1220_v55 = vunpack.c.l.b16 %v1450_v45  ;;  %v1222_v59 = vunpack.c.l.b16 %v1452_v46 }
 0x21a   : > { %v1048_v62 = vrot.slane %v1047_v42, 1  ;;  %v1066_v52 = vrot.slane %v1065_v43, 1  ;;  %v1223_v60 = vunpack.c.l.b16 %v1453_v47  ;;  %v1061_v61 = vmax.f32 %v1059_v38, %v1060_v48 }
 0x21b   : > { %v1451_v50 = vpack.c.bf16 %v1031_v6, %v1031_v6  ;;  %v1052_v53 = vrot.slane %v1051_v23, 2 }
 0x21c   : > { %v1049_v39 = vmax.f32 %v1047_v42, %v1048_v62  ;;  %v1067_v1 = vmax.f32 %v1065_v43, %v1066_v52  ;;  %v1456_v7 = vpack.c.bf16 %v1061_v61, %v1061_v61 }
 0x21d   : > { %v1221_v44 = vunpack.c.l.b16 %v1451_v50  ;;  %v1053_v57 = vmax.f32 %v1051_v23, %v1052_v53 }
 0x21e   : > { %v1454_v49 = vpack.c.bf16 %v1049_v39, %v1049_v39  ;;  %v1457_v9 = vpack.c.bf16 %v1067_v1, %v1067_v1  ;;  %v1226_v12 = vunpack.c.l.b16 %v1456_v7 }
 0x21f   : > { %v1256_v63 = vsel %vm1228_vm3, %v1221_v44, %v1220_v55  ;;  %v1054_v2 = vrot.slane %v1053_v57, 1 }
 0x220   : > { %v1224_v0 = vunpack.c.l.b16 %v1454_v49  ;;  %v1257_v3 = vsel %vm1230_vm4, %v1222_v59, %v1256_v63  ;;  %v1227_v28 = vunpack.c.l.b16 %v1457_v9 }
 0x221   : > { %v1258_v4 = vsel %vm1232_vm5, %v1223_v60, %v1257_v3  ;;  %v1055_v5 = vmax.f32 %v1053_v57, %v1054_v2 }
 0x222   : > { %v1259_v8 = vsel %vm1234_vm6, %v1224_v0, %v1258_v4 }
 0x223   : > { %v1455_v20 = vpack.c.bf16 %v1055_v5, %v1055_v5 }
 0x225   : > { %v1225_v10 = vunpack.c.l.b16 %v1455_v20 }
 0x227   : > { %v1260_v13 = vsel %vm1236_vm7, %v1225_v10, %v1259_v8 }
 0x228   : > { %v1261_v15 = vsel %vm1238_vm8, %v1226_v12, %v1260_v13 }
 0x229   : > { %v1262_v16 = vsel %vm1240_vm9, %v1227_v28, %v1261_v15 }
 0x22a   : > { %v1266_v17 = vpack.c.b16 %v1262_v16, %v1262_v16 }
 0x22c   : > { %1274 = vst [vmem:[%s1777_s14 + $0xc] sm:$0xf] %v1266_v17 }
 0x22d PF: > { %s15_s18 = sadd.s32 1, %s1596_s18  }
 0x22e   : > { %p12_p5 = scmp.ge.s32.totalorder %s15_s18, 4  }
 0x230   :  { %14 = sbr.rel (!%p12_p5) target bundleno = 1 (0x1), region = 70 }

</bundles_post_ra>
